<compile_context>
chip_gen: v7x
topology: tpu7x:2x2x1
jax: 0.10.0
libtpu: 0.0.40
codegen_flags: <defaults>
</compile_context>

<pallas_src>
import functools

import jax
import jax.numpy as jnp
from jax import lax
from jax.experimental import pallas as pl
from jax.experimental.pallas import tpu as pltpu

LUE = 1.051
MEAN_VPD = 0.0
STD_VPD = 1.0
HIDDEN = 128
# lue * 0.45 (apar scale) * (1/16.5) (tmin ramp denom) folded into fc2 weight/bias.
OUT_SCALE = LUE * 0.45 / 16.5


def hybrid_kernel(x_ref, w1_ref, b1_ref, w2_ref, b2_ref, o_ref, *, chunk):
    # x_ref : (4, tile) feature-major rows [swrad, tmin, vpd, fpar], lane-dense.
    # w1_ref: (H, 1)   fc1 weight / std_vpd (normalization folded)
    # b1_ref: (H, 1)   fc1 bias - mean_vpd * w1 / std_vpd
    # w2_ref: (1, H)   OUT_SCALE * fc2 weight
    # b2_ref: (1, 1)   OUT_SCALE * fc2 bias (SMEM scalar)
    w1 = w1_ref[...]                      # hoisted once; small (H,1) column
    b1 = b1_ref[...]
    w2 = w2_ref[...]
    b2 = b2_ref[0, 0]

    tile = x_ref.shape[1]
    n_chunks = tile // chunk              # static

    def body(c, carry):
        off = pl.multiple_of(c * chunk, chunk)   # chunk is a multiple of 128
        swrad = x_ref[0:1, pl.ds(off, chunk)]    # (1, chunk)
        tmin = x_ref[1:2, pl.ds(off, chunk)]
        vpd = x_ref[2:3, pl.ds(off, chunk)]
        fpar = x_ref[3:4, pl.ds(off, chunk)]

        # fc1 (+ input normalization + bias, pre-folded) on the VPU, exact f32.
        h = jnp.maximum(w1 * vpd + b1, 0.0)      # (H, chunk) broadcast outer product

        # fc2: K=128 contraction on the MXU -> (1, chunk).
        vpd_scalar = jnp.dot(w2, h, preferred_element_type=jnp.float32) + b2

        # MODIS tmin ramp + APAR; /16.5, *0.45 and *lue already folded into w2/b2.
        env = (jnp.clip(tmin, -7.0, 9.5) + 7.0) * swrad * fpar
        o_ref[:, pl.ds(off, chunk)] = (env * vpd_scalar).astype(o_ref.dtype)
        return carry

    lax.fori_loop(0, n_chunks, body, 0, unroll=(n_chunks <= 8))


@functools.partial(jax.jit, static_argnames=("tile", "chunk"))
def hybrid_model(x, w1, b1, w2, b2, *, tile=32768, chunk=2048):
    """x: (N, 5) f32 columns [swrad, tmin, vpd, fpar, swc]; PyTorch-layout Linear
    params w1 (128,1), b1 (128,), w2 (1,128), b2 (1,). Returns (N, 1)."""
    N = x.shape[0]
    assert chunk % 128 == 0 and tile % 128 == 0

    # --- pick inner chunk and grid tile (all static Python ints) ---
    n_lanes = pl.cdiv(N, 128) * 128
    chunk = min(chunk, n_lanes)                       # shrink for tiny batches
    tile = max(chunk, (tile // chunk) * chunk)        # tile is a multiple of chunk
    n_chunks_total = pl.cdiv(N, chunk)
    if n_chunks_total >= 2:
        # keep >= 2 grid steps when the data allows (v7x has 2 TensorCores)
        tile = min(tile, pl.cdiv(n_chunks_total, 2) * chunk)
    else:
        tile = chunk
    n_pad = pl.cdiv(N, tile) * tile

    # Feature-major, lane-dense slab: contiguous slice + transpose, no extra rows.
    x_t = x[:, :4].astype(jnp.float32).T              # (4, N) rows [swrad,tmin,vpd,fpar]
    if n_pad != N:
        x_t = jnp.pad(x_t, ((0, 0), (0, n_pad - N)))

    # Fold (vpd - mean)/std into fc1; pre-scale fc2 by lue * 0.45 / 16.5.
    w1c = w1.reshape(HIDDEN, 1).astype(jnp.float32) / STD_VPD
    b1c = b1.reshape(HIDDEN, 1).astype(jnp.float32) - MEAN_VPD * w1c
    w2r = (OUT_SCALE * w2).reshape(1, HIDDEN).astype(jnp.float32)
    b2s = (OUT_SCALE * b2).reshape(1, 1).astype(jnp.float32)

    grid = (n_pad // tile,)
    out = pl.pallas_call(
        functools.partial(hybrid_kernel, chunk=chunk),
        out_shape=jax.ShapeDtypeStruct((1, n_pad), jnp.float32),
        grid=grid,
        in_specs=[
            pl.BlockSpec((4, tile), lambda i: (0, i)),             # x slab, lane-tiled
            pl.BlockSpec((HIDDEN, 1), lambda i: (0, 0)),           # w1 resident
            pl.BlockSpec((HIDDEN, 1), lambda i: (0, 0)),           # b1 resident
            pl.BlockSpec((1, HIDDEN), lambda i: (0, 0)),           # w2 resident
            pl.BlockSpec((1, 1), lambda i: (0, 0),
                         memory_space=pltpu.MemorySpace.SMEM),     # b2 scalar
        ],
        out_specs=pl.BlockSpec((1, tile), lambda i: (0, i)),       # lane-dense store
        compiler_params=pltpu.CompilerParams(
            dimension_semantics=("parallel",),
            vmem_limit_bytes=32 * 1024 * 1024,
        ),
    )(x_t, w1c, b1c, w2r, b2s)

    return out[:, :N].reshape(N, 1)


def reference(x, w1, b1, w2, b2):
    """Pure-JAX transcription of HybridModel.forward (default flags)."""
    swrad, tmin, vpd, fpar = x[:, 0:1], x[:, 1:2], x[:, 2:3], x[:, 3:4]
    vpd_n = (vpd - MEAN_VPD) / STD_VPD
    h = jnp.maximum(vpd_n @ w1.T + b1[None, :], 0.0)
    vpd_scalar = h @ w2.T + b2[None, :]
    tmin_scalar = (jnp.clip(tmin, -7.0, 9.5) + 7.0) / 16.5
    apar = swrad * 0.45 * fpar
    return LUE * tmin_scalar * vpd_scalar * apar


if __name__ == "__main__":
    key = jax.random.PRNGKey(0)
    kx, k1, k2, k3, k4 = jax.random.split(key, 5)

    N = 300  # not a multiple of 128 -> exercises padding / clamped tile
    # 5 input features per row: [swrad, tmin, vpd, fpar, swc] (swc unused by default flags)
    x = jax.random.uniform(kx, (N, 5), jnp.float32, minval=-2.0, maxval=2.0)

    # PyTorch-layout Linear params.
    w1 = jax.random.uniform(k1, (HIDDEN, 1), jnp.float32, minval=-1.0, maxval=1.0)
    b1 = jax.random.uniform(k2, (HIDDEN,), jnp.float32, minval=-1.0, maxval=1.0)
    bound = 1.0 / (HIDDEN ** 0.5)
    w2 = jax.random.uniform(k3, (1, HIDDEN), jnp.float32, minval=-bound, maxval=bound)
    b2 = jax.random.uniform(k4, (1,), jnp.float32, minval=-bound, maxval=bound)

    ref = reference(x, w1, b1, w2, b2)

    # Default (large-tile) config: tile/chunk auto-clamped for the small batch.
    out = jax.block_until_ready(hybrid_model(x, w1, b1, w2, b2))
    assert out.shape == (N, 1)
    assert jnp.allclose(out, ref, atol=1e-4, rtol=1e-4), float(jnp.max(jnp.abs(out - ref)))

    # Small-tile config: exercises multi-step grid + multi-chunk inner fori_loop.
    out2 = jax.block_until_ready(hybrid_model(x, w1, b1, w2, b2, tile=256, chunk=128))
    assert jnp.allclose(out2, ref, atol=1e-4, rtol=1e-4), float(jnp.max(jnp.abs(out2 - ref)))

    # TODO(synk): fc3..fc9/fca branches (replace_tmin/apar/swc/combine) and train_lue are
    # dead under the default flags and are intentionally not emitted in the kernel.
    print("KERNEL_OK")
</pallas_src>

<mosaic_0001>
module attributes {stable_mosaic.version = 11 : i64} {
  func.func @hybrid_kernel(%arg0: i32, %arg1: memref<4x384xf32, #tpu.memory_space<vmem>>, %arg2: memref<128x1xf32, #tpu.memory_space<vmem>>, %arg3: memref<128x1xf32, #tpu.memory_space<vmem>>, %arg4: memref<1x128xf32, #tpu.memory_space<vmem>>, %arg5: memref<1x1xf32, #tpu.memory_space<smem>>, %arg6: memref<1x384xf32, #tpu.memory_space<vmem>>) attributes {dimension_semantics = [#tpu.dimension_semantics<parallel>], iteration_bounds = array<i64: 1>, scalar_prefetch = 0 : i64, scratch_operands = 0 : i64, tpu.core_type = #tpu.core_type<tc>, window_params = [{transform_indices = @transform_0, window_bounds = array<i64: 4, 384>}, {pipeline_mode = #tpu.pipeline_mode<synchronous>, transform_indices = @transform_1, window_bounds = array<i64: 128, 1>}, {pipeline_mode = #tpu.pipeline_mode<synchronous>, transform_indices = @transform_2, window_bounds = array<i64: 128, 1>}, {pipeline_mode = #tpu.pipeline_mode<synchronous>, transform_indices = @transform_3, window_bounds = array<i64: 1, 128>}, {transform_indices = @transform_4, window_bounds = array<i64: 1, 1>}, {transform_indices = @transform_5, window_bounds = array<i64: 1, 384>}]} {
    %c0 = arith.constant 0 : index
    %c0_0 = arith.constant 0 : index
    %0 = vector.load %arg2[%c0, %c0_0] : memref<128x1xf32, #tpu.memory_space<vmem>>, vector<128x1xf32>
    %c0_1 = arith.constant 0 : index
    %c0_2 = arith.constant 0 : index
    %1 = vector.load %arg3[%c0_1, %c0_2] : memref<128x1xf32, #tpu.memory_space<vmem>>, vector<128x1xf32>
    %c0_3 = arith.constant 0 : index
    %c0_4 = arith.constant 0 : index
    %2 = vector.load %arg4[%c0_3, %c0_4] : memref<1x128xf32, #tpu.memory_space<vmem>>, vector<1x128xf32>
    %c0_5 = arith.constant 0 : index
    %c0_6 = arith.constant 0 : index
    %3 = memref.load %arg5[%c0_5, %c0_6] : memref<1x1xf32, #tpu.memory_space<smem>>
    %c0_i32 = arith.constant 0 : i32
    %c384_i32 = arith.constant 384 : i32
    %4 = arith.muli %c0_i32, %c384_i32 : i32
    %5 = tpu.assume_multiple %4, 384 : i32
    %c0_7 = arith.constant 0 : index
    %6 = arith.index_cast %5 : i32 to index
    %7 = vector.load %arg1[%c0_7, %6] : memref<4x384xf32, #tpu.memory_space<vmem>>, vector<1x384xf32>
    %c1 = arith.constant 1 : index
    %8 = arith.index_cast %5 : i32 to index
    %9 = vector.load %arg1[%c1, %8] : memref<4x384xf32, #tpu.memory_space<vmem>>, vector<1x384xf32>
    %c2 = arith.constant 2 : index
    %10 = arith.index_cast %5 : i32 to index
    %11 = vector.load %arg1[%c2, %10] : memref<4x384xf32, #tpu.memory_space<vmem>>, vector<1x384xf32>
    %c3 = arith.constant 3 : index
    %12 = arith.index_cast %5 : i32 to index
    %13 = vector.load %arg1[%c3, %12] : memref<4x384xf32, #tpu.memory_space<vmem>>, vector<1x384xf32>
    %14 = vector.broadcast %0 : vector<128x1xf32> to vector<128x384xf32>
    %15 = vector.broadcast %11 : vector<1x384xf32> to vector<128x384xf32>
    %16 = arith.mulf %14, %15 : vector<128x384xf32>
    %17 = vector.broadcast %1 : vector<128x1xf32> to vector<128x384xf32>
    %18 = arith.addf %16, %17 : vector<128x384xf32>
    %cst = arith.constant 0.000000e+00 : f32
    %19 = vector.broadcast %cst : f32 to vector<128x384xf32>
    %20 = arith.maximumf %18, %19 : vector<128x384xf32>
    %cst_8 = arith.constant dense<0.000000e+00> : vector<1x384xf32>
    %21 = tpu.matmul %2, %20, %cst_8 {dimension_numbers = #tpu.dot_dimension_numbers<[1], [0], [0], [1], [0, 0, 1, 1], [], []>} : vector<1x128xf32>, vector<128x384xf32>, vector<1x384xf32> -> vector<1x384xf32>
    %22 = vector.broadcast %3 : f32 to vector<1x384xf32>
    %23 = arith.addf %21, %22 : vector<1x384xf32>
    %cst_9 = arith.constant -7.000000e+00 : f32
    %cst_10 = arith.constant 9.500000e+00 : f32
    %24 = vector.broadcast %cst_9 : f32 to vector<1x384xf32>
    %25 = arith.maximumf %24, %9 : vector<1x384xf32>
    %26 = vector.broadcast %cst_10 : f32 to vector<1x384xf32>
    %27 = arith.minimumf %26, %25 : vector<1x384xf32>
    %cst_11 = arith.constant 7.000000e+00 : f32
    %28 = vector.broadcast %cst_11 : f32 to vector<1x384xf32>
    %29 = arith.addf %27, %28 : vector<1x384xf32>
    %30 = arith.mulf %29, %7 : vector<1x384xf32>
    %31 = arith.mulf %30, %13 : vector<1x384xf32>
    %32 = arith.mulf %31, %23 : vector<1x384xf32>
    %c0_12 = arith.constant 0 : index
    %33 = arith.index_cast %5 : i32 to index
    %34 = vector.load %arg6[%c0_12, %33] : memref<1x384xf32, #tpu.memory_space<vmem>>, vector<1x384xf32>
    tpu.vector_store %arg6[%c0_12, %33], %32 {strides = array<i32>} : memref<1x384xf32, #tpu.memory_space<vmem>>, vector<1x384xf32>,
    %c1_i32 = arith.constant 1 : i32
    return
  }
  func.func @transform_0(%arg0: i32) -> (i32, i32) {
    %c0_i32 = arith.constant 0 : i32
    %c0_i32_0 = arith.constant 0 : i32
    return %c0_i32, %arg0 : i32, i32
  }
  func.func @transform_1(%arg0: i32) -> (i32, i32) {
    %c0_i32 = arith.constant 0 : i32
    %c0_i32_0 = arith.constant 0 : i32
    %c0_i32_1 = arith.constant 0 : i32
    return %c0_i32, %c0_i32_0 : i32, i32
  }
  func.func @transform_2(%arg0: i32) -> (i32, i32) {
    %c0_i32 = arith.constant 0 : i32
    %c0_i32_0 = arith.constant 0 : i32
    %c0_i32_1 = arith.constant 0 : i32
    return %c0_i32, %c0_i32_0 : i32, i32
  }
  func.func @transform_3(%arg0: i32) -> (i32, i32) {
    %c0_i32 = arith.constant 0 : i32
    %c0_i32_0 = arith.constant 0 : i32
    %c0_i32_1 = arith.constant 0 : i32
    return %c0_i32, %c0_i32_0 : i32, i32
  }
  func.func @transform_4(%arg0: i32) -> (i32, i32) {
    %c0_i32 = arith.constant 0 : i32
    %c0_i32_0 = arith.constant 0 : i32
    %c0_i32_1 = arith.constant 0 : i32
    return %c0_i32, %c0_i32_0 : i32, i32
  }
  func.func @transform_5(%arg0: i32) -> (i32, i32) {
    %c0_i32 = arith.constant 0 : i32
    %c0_i32_0 = arith.constant 0 : i32
    return %c0_i32, %arg0 : i32, i32
  }
}

</mosaic_0001>

<bundles_post_ra>
// kernel: hybrid_model.1
= control target key start
LH: loop header
LB: loop body
LE: loop exit
PB: predicated region body
PF: predicated region fallthrough
CT: control target
= control target key end

     0   :  { %v684_v0 = vmov 0   ;;  %v685_v9 = vmov 0.0|0.0   ;;  %v686_v34 = vmov 0.0   ;;  %vm687_vm0 = vmmov 0   ;;  %s906_s2 = inlined_call_operand.vmem [shape: f32[128,1], index: 2, kind: input, shape index: {}]   ;;  %s907_s1 = inlined_call_operand.vmem [shape: f32[128,1], index: 1, kind: input, shape index: {}]   ;;  %s908_s0 = inlined_call_operand.vmem [shape: f32[4,384], index: 0, kind: input, shape index: {}]   ;;  %s909_s3 = inlined_call_operand.vmem [shape: f32[1,128], index: 3, kind: input, shape index: {}]   ;;  %s910_s4 = inlined_call_operand.<no memory space> [shape: f32[1,1], index: 4, kind: input, shape index: {}]   ;;  %s911_s5 = inlined_call_operand.vmem [shape: f32[1,384], index: 5, kind: output, shape index: {}]  }
   0x1   :  { %683 = vset.pattern.permute.xlu1 %v684_v0  ;;  %682 = vset.pattern.permute.xlu0 %v684_v0  ;;  %v37_v1 = vld [vmem:[%s906_s2] sm:$0xff]  ;;  %v38_v3 = vld [vmem:[%s906_s2 + $0x8] sm:$0xff]  ;;  %v24_v5 = vld [vmem:[%s907_s1 + $0x18] sm:$0xff]  ;;  %v143_v35 = vlaneseq }
   0x2   :  { %v21_v2 = vld [vmem:[%s907_s1] sm:$0xff]  ;;  %208 = vperm.xlu1 %683, %v37_v1   ;;  %v22_v4 = vld [vmem:[%s907_s1 + $0x8] sm:$0xff]  ;;  %v23_v6 = vld [vmem:[%s907_s1 + $0x10] sm:$0xff]  ;;  %653 = vmatprep.subr.bf16.mxu1 %v685_v9 }
   0x3   :  { %64 = vperm.xlu0 %682, %v21_v2   ;;  %v40_v7 = vld [vmem:[%s906_s2 + $0x18] sm:$0xff]  ;;  %v39_v8 = vld [vmem:[%s906_s2 + $0x10] sm:$0xff]  ;;  %v26_v10 = vld [vmem:[%s907_s1 + $0x28] sm:$0xff]  ;;  %447 = vmatprep.mubr.f32.mxu0 %v686_v34  ;;  %v817_v36 = vshrl.u32 %v143_v35, 7  ;;  %vm559_vm1 = vcmp.lt.s32.totalorder %v143_v35, 384 }
   0x4   :  { %v25_v11 = vld [vmem:[%s907_s1 + $0x20] sm:$0xff]  ;;  %v42_v12 = vld [vmem:[%s906_s2 + $0x28] sm:$0xff]  ;;  %v28_v14 = vld [vmem:[%s907_s1 + $0x38] sm:$0xff]  ;;  %618 = vmatprep.mubr.msk.f32.mxu1 %vm687_vm0, %v686_v34 }
   0x5   :  { %v41_v13 = vld [vmem:[%s906_s2 + $0x20] sm:$0xff]  ;;  %v27_v15 = vld [vmem:[%s907_s1 + $0x30] sm:$0xff]  ;;  %v44_v16 = vld [vmem:[%s906_s2 + $0x38] sm:$0xff]  ;;  %v149_v37 = vsub.s32 1, %v817_v36  ;;  %v153_v38 = vsub.s32 2, %v817_v36  ;;  %v145_v39 = vsub.s32 0, %v817_v36 }
   0x6   :  { %213 = vperm.xlu1 %683, %v38_v3   ;;  %v43_v17 = vld [vmem:[%s906_s2 + $0x30] sm:$0xff]  ;;  %v30_v18 = vld [vmem:[%s907_s1 + $0x48] sm:$0xff]  ;;  %v29_v19 = vld [vmem:[%s907_s1 + $0x40] sm:$0xff] }
   0x7   :  { %69 = vperm.xlu0 %682, %v22_v4   ;;  %v46_v20 = vld [vmem:[%s906_s2 + $0x48] sm:$0xff]  ;;  %v45_v21 = vld [vmem:[%s906_s2 + $0x40] sm:$0xff]  ;;  %v32_v22 = vld [vmem:[%s907_s1 + $0x58] sm:$0xff] }
   0x8   :  { %v31_v23 = vld [vmem:[%s907_s1 + $0x50] sm:$0xff]  ;;  %v48_v24 = vld [vmem:[%s906_s2 + $0x58] sm:$0xff]  ;;  %v34_v26 = vld [vmem:[%s907_s1 + $0x68] sm:$0xff] }
   0x9   :  { %v47_v25 = vld [vmem:[%s906_s2 + $0x50] sm:$0xff]  ;;  %v33_v27 = vld [vmem:[%s907_s1 + $0x60] sm:$0xff]  ;;  %v50_v28 = vld [vmem:[%s906_s2 + $0x68] sm:$0xff] }
   0xa   :  { %79 = vperm.xlu1 %683, %v24_v5   ;;  %v49_v29 = vld [vmem:[%s906_s2 + $0x60] sm:$0xff]  ;;  %v36_v30 = vld [vmem:[%s907_s1 + $0x78] sm:$0xff]  ;;  %v35_v31 = vld [vmem:[%s907_s1 + $0x70] sm:$0xff] }
   0xb   :  { %74 = vperm.xlu0 %682, %v23_v6   ;;  %v52_v32 = vld [vmem:[%s906_s2 + $0x78] sm:$0xff]  ;;  %v51_v33 = vld [vmem:[%s906_s2 + $0x70] sm:$0xff]  ;;  %v567_v40 = vld [vmem:[%s908_s0 + $0x2] ss:$4 sm:$0x7] }
   0xc   :  { %v825_v41 = vrot.slane %v567_v40, %v149_v37  ;;  %v827_v42 = vrot.slane %v567_v40, %v153_v38  ;;  %v829_v43 = vrot.slane %v567_v40, %v145_v39 }
   0xe   :  { %223 = vperm.xlu1 %683, %v40_v7  }
   0xf   :  { %218 = vperm.xlu0 %682, %v39_v8  }
  0x12   :  { %89 = vperm.xlu1 %683, %v26_v10  }
  0x13   :  { %84 = vperm.xlu0 %682, %v25_v11  }
  0x16   :  { %233 = vperm.xlu1 %683, %v42_v12  }
  0x17   :  { %228 = vperm.xlu0 %682, %v41_v13  }
  0x1a   :  { %99 = vperm.xlu1 %683, %v28_v14  }
  0x1b   :  { %94 = vperm.xlu0 %682, %v27_v15  }
  0x1e   :  { %243 = vperm.xlu1 %683, %v44_v16  }
  0x1f   :  { %238 = vperm.xlu0 %682, %v43_v17  }
  0x22   :  { %109 = vperm.xlu1 %683, %v30_v18  }
  0x23   :  { %104 = vperm.xlu0 %682, %v29_v19  }
  0x26   :  { %253 = vperm.xlu1 %683, %v46_v20  }
  0x27   :  { %248 = vperm.xlu0 %682, %v45_v21  }
  0x2a   :  { %119 = vperm.xlu1 %683, %v32_v22  }
  0x2b   :  { %114 = vperm.xlu0 %682, %v31_v23  }
  0x2e   :  { %263 = vperm.xlu1 %683, %v48_v24  }
  0x2f   :  { %258 = vperm.xlu0 %682, %v47_v25  }
  0x32   :  { %129 = vperm.xlu1 %683, %v34_v26  }
  0x33   :  { %124 = vperm.xlu0 %682, %v33_v27  }
  0x36   :  { %273 = vperm.xlu1 %683, %v50_v28  }
  0x37   :  { %268 = vperm.xlu0 %682, %v49_v29  }
  0x3a   :  { %139 = vperm.xlu1 %683, %v36_v30  }
  0x3b   :  { %134 = vperm.xlu0 %682, %v35_v31  }
  0x3e   :  { %283 = vperm.xlu1 %683, %v52_v32  }
  0x3f   :  { %278 = vperm.xlu0 %682, %v51_v33  }
  0x81   :  { %v209_v44 = vpop.permute.xlu1 %208 }
  0x82   :  { %v65_v45 = vpop.permute.xlu0 %64 }
  0x83   :  { %v159_v46 = vmul.f32 %v825_v41, %v65_v45  ;;  %v160_v47 = vmul.f32 %v827_v42, %v65_v45  ;;  %v158_v48 = vmul.f32 %v829_v43, %v65_v45 }
  0x85   :  { %v214_v49 = vpop.permute.xlu1 %213  ;;  %v287_v51 = vadd.f32 %v209_v44, %v159_v46  ;;  %v288_v55 = vadd.f32 %v209_v44, %v160_v47  ;;  %v286_v56 = vadd.f32 %v209_v44, %v158_v48 }
  0x86   :  { %v70_v50 = vpop.permute.xlu0 %69 }
  0x87   :  { %v161_v52 = vmul.f32 %v829_v43, %v70_v50  ;;  %v162_v53 = vmul.f32 %v825_v41, %v70_v50  ;;  %v163_v54 = vmul.f32 %v827_v42, %v70_v50  ;;  %v335_v62 = vmax.f32 %v287_v51, 0.0 }
  0x88   :  { %v336_v63 = vmax.f32 %v288_v55, 0.0  ;;  %v334_v3 = vmax.f32 %v286_v56, 0.0 }
  0x89   :  { %v290_v57 = vadd.f32 %v214_v49, %v162_v53  ;;  %v291_v58 = vadd.f32 %v214_v49, %v163_v54  ;;  %v289_v59 = vadd.f32 %v214_v49, %v161_v52  ;;  %v80_v60 = vpop.permute.xlu1 %79 }
  0x8a   :  { %v75_v61 = vpop.permute.xlu0 %74  ;;  %v167_v0 = vmul.f32 %v829_v43, %v80_v60  ;;  %v168_v4 = vmul.f32 %v825_v41, %v80_v60  ;;  %v169_v5 = vmul.f32 %v827_v42, %v80_v60 }
  0x8b   :  { %v338_v1 = vmax.f32 %v290_v57, 0.0  ;;  %v339_v2 = vmax.f32 %v291_v58, 0.0  ;;  %v164_v6 = vmul.f32 %v829_v43, %v75_v61  ;;  %v337_v7 = vmax.f32 %v289_v59, 0.0 }
  0x8c   :  { %v165_v8 = vmul.f32 %v825_v41, %v75_v61  ;;  %v166_v10 = vmul.f32 %v827_v42, %v75_v61 }
  0x8d   :  { %v224_v11 = vpop.permute.xlu1 %223  ;;  %v621_v13 = vpack.c.bf16 %v338_v1, %v335_v62  ;;  %v654_v14 = vpack.c.bf16 %v339_v2, %v336_v63  ;;  %v623_v21 = vpack.c.bf16 %v337_v7, %v334_v3 }
  0x8e   :  { %v219_v12 = vpop.permute.xlu0 %218  ;;  %v295_v15 = vadd.f32 %v224_v11, %v167_v0  ;;  %v296_v16 = vadd.f32 %v224_v11, %v168_v4  ;;  %v297_v17 = vadd.f32 %v224_v11, %v169_v5 }
  0x8f   :  { %v292_v18 = vadd.f32 %v219_v12, %v164_v6  ;;  %v293_v19 = vadd.f32 %v219_v12, %v165_v8  ;;  %v294_v20 = vadd.f32 %v219_v12, %v166_v10  ;;  %622 = vmatprep.subr.bf16.mxu0 %v621_v13  ;;  %655 = vmatpush3.bf16.msra.mxu1 %v654_v14 }
  0x90   :  { %v343_v22 = vmax.f32 %v295_v15, 0.0  ;;  %v344_v23 = vmax.f32 %v296_v16, 0.0  ;;  %v345_v24 = vmax.f32 %v297_v17, 0.0  ;;  %656 = vmatprep.subr.bf16.mxu1 %v685_v9  ;;  %624 = vmatpush1.bf16.msra.mxu0 %v623_v21 }
  0x91   :  { %v340_v25 = vmax.f32 %v292_v18, 0.0  ;;  %v341_v26 = vmax.f32 %v293_v19, 0.0  ;;  %v342_v27 = vmax.f32 %v294_v20, 0.0  ;;  %v90_v28 = vpop.permute.xlu1 %89 }
  0x92   :  { %v85_v29 = vpop.permute.xlu0 %84  ;;  %v173_v30 = vmul.f32 %v829_v43, %v90_v28  ;;  %v174_v33 = vmul.f32 %v825_v41, %v90_v28  ;;  %v175_v34 = vmul.f32 %v827_v42, %v90_v28 }
  0x93   :  { %v625_v31 = vpack.c.bf16 %v344_v23, %v341_v26  ;;  %v657_v32 = vpack.c.bf16 %v345_v24, %v342_v27  ;;  %v170_v37 = vmul.f32 %v829_v43, %v85_v29  ;;  %v627_v38 = vpack.c.bf16 %v343_v22, %v340_v25 }
  0x94   :  { %v171_v39 = vmul.f32 %v825_v41, %v85_v29  ;;  %v172_v40 = vmul.f32 %v827_v42, %v85_v29 }
  0x95   :  { %626 = vmatprep.subr.bf16.mxu0 %v625_v31  ;;  %658 = vmatpush3.bf16.msra.mxu1 %v657_v32  ;;  %v234_v44 = vpop.permute.xlu1 %233 }
  0x96   :  { %v229_v45 = vpop.permute.xlu0 %228  ;;  %v301_v46 = vadd.f32 %v234_v44, %v173_v30  ;;  %v302_v47 = vadd.f32 %v234_v44, %v174_v33  ;;  %v303_v48 = vadd.f32 %v234_v44, %v175_v34  ;;  %628 = vmatpush1.bf16.msra.mxu0 %v627_v38  ;;  %659 = vmatprep.subr.bf16.mxu1 %v685_v9 }
  0x97   :  { %v298_v49 = vadd.f32 %v229_v45, %v170_v37  ;;  %v299_v50 = vadd.f32 %v229_v45, %v171_v39  ;;  %v300_v51 = vadd.f32 %v229_v45, %v172_v40 }
  0x98   :  { %v349_v52 = vmax.f32 %v301_v46, 0.0  ;;  %v350_v53 = vmax.f32 %v302_v47, 0.0  ;;  %v351_v54 = vmax.f32 %v303_v48, 0.0 }
  0x99   :  { %v346_v55 = vmax.f32 %v298_v49, 0.0  ;;  %v347_v56 = vmax.f32 %v299_v50, 0.0  ;;  %v348_v57 = vmax.f32 %v300_v51, 0.0  ;;  %v100_v58 = vpop.permute.xlu1 %99 }
  0x9a   :  { %v95_v59 = vpop.permute.xlu0 %94  ;;  %v179_v60 = vmul.f32 %v829_v43, %v100_v58  ;;  %v180_v63 = vmul.f32 %v825_v41, %v100_v58  ;;  %v181_v0 = vmul.f32 %v827_v42, %v100_v58 }
  0x9b   :  { %v629_v61 = vpack.c.bf16 %v350_v53, %v347_v56  ;;  %v660_v62 = vpack.c.bf16 %v351_v54, %v348_v57  ;;  %v176_v1 = vmul.f32 %v829_v43, %v95_v59  ;;  %v631_v2 = vpack.c.bf16 %v349_v52, %v346_v55 }
  0x9c   :  { %v177_v3 = vmul.f32 %v825_v41, %v95_v59  ;;  %v178_v4 = vmul.f32 %v827_v42, %v95_v59 }
  0x9d   :  { %630 = vmatprep.subr.bf16.mxu0 %v629_v61  ;;  %661 = vmatpush3.bf16.msra.mxu1 %v660_v62  ;;  %v244_v5 = vpop.permute.xlu1 %243 }
  0x9e   :  { %v239_v6 = vpop.permute.xlu0 %238  ;;  %v307_v7 = vadd.f32 %v244_v5, %v179_v60  ;;  %v308_v8 = vadd.f32 %v244_v5, %v180_v63  ;;  %v309_v10 = vadd.f32 %v244_v5, %v181_v0  ;;  %632 = vmatpush1.bf16.msra.mxu0 %v631_v2  ;;  %662 = vmatprep.subr.bf16.mxu1 %v685_v9 }
  0x9f   :  { %v304_v11 = vadd.f32 %v239_v6, %v176_v1  ;;  %v305_v12 = vadd.f32 %v239_v6, %v177_v3  ;;  %v306_v13 = vadd.f32 %v239_v6, %v178_v4 }
  0xa0   :  { %v355_v14 = vmax.f32 %v307_v7, 0.0  ;;  %v356_v15 = vmax.f32 %v308_v8, 0.0  ;;  %v357_v16 = vmax.f32 %v309_v10, 0.0 }
  0xa1   :  { %v352_v17 = vmax.f32 %v304_v11, 0.0  ;;  %v353_v18 = vmax.f32 %v305_v12, 0.0  ;;  %v354_v19 = vmax.f32 %v306_v13, 0.0  ;;  %v110_v20 = vpop.permute.xlu1 %109 }
  0xa2   :  { %v105_v21 = vpop.permute.xlu0 %104  ;;  %v185_v22 = vmul.f32 %v829_v43, %v110_v20  ;;  %v186_v25 = vmul.f32 %v825_v41, %v110_v20  ;;  %v187_v26 = vmul.f32 %v827_v42, %v110_v20 }
  0xa3   :  { %v633_v23 = vpack.c.bf16 %v356_v15, %v353_v18  ;;  %v663_v24 = vpack.c.bf16 %v357_v16, %v354_v19  ;;  %v182_v27 = vmul.f32 %v829_v43, %v105_v21  ;;  %v635_v28 = vpack.c.bf16 %v355_v14, %v352_v17 }
  0xa4   :  { %v183_v29 = vmul.f32 %v825_v41, %v105_v21  ;;  %v184_v30 = vmul.f32 %v827_v42, %v105_v21 }
  0xa5   :  { %634 = vmatprep.subr.bf16.mxu0 %v633_v23  ;;  %664 = vmatpush3.bf16.msra.mxu1 %v663_v24  ;;  %v254_v31 = vpop.permute.xlu1 %253 }
  0xa6   :  { %v249_v32 = vpop.permute.xlu0 %248  ;;  %v313_v33 = vadd.f32 %v254_v31, %v185_v22  ;;  %v314_v34 = vadd.f32 %v254_v31, %v186_v25  ;;  %v315_v37 = vadd.f32 %v254_v31, %v187_v26  ;;  %636 = vmatpush1.bf16.msra.mxu0 %v635_v28  ;;  %665 = vmatprep.subr.bf16.mxu1 %v685_v9 }
  0xa7   :  { %v310_v38 = vadd.f32 %v249_v32, %v182_v27  ;;  %v311_v39 = vadd.f32 %v249_v32, %v183_v29  ;;  %v312_v40 = vadd.f32 %v249_v32, %v184_v30 }
  0xa8   :  { %v361_v44 = vmax.f32 %v313_v33, 0.0  ;;  %v362_v45 = vmax.f32 %v314_v34, 0.0  ;;  %v363_v46 = vmax.f32 %v315_v37, 0.0 }
  0xa9   :  { %v358_v47 = vmax.f32 %v310_v38, 0.0  ;;  %v359_v48 = vmax.f32 %v311_v39, 0.0  ;;  %v360_v49 = vmax.f32 %v312_v40, 0.0  ;;  %v120_v50 = vpop.permute.xlu1 %119 }
  0xaa   :  { %v115_v51 = vpop.permute.xlu0 %114  ;;  %v191_v52 = vmul.f32 %v829_v43, %v120_v50  ;;  %v192_v55 = vmul.f32 %v825_v41, %v120_v50  ;;  %v193_v56 = vmul.f32 %v827_v42, %v120_v50 }
  0xab   :  { %v637_v53 = vpack.c.bf16 %v362_v45, %v359_v48  ;;  %v666_v54 = vpack.c.bf16 %v363_v46, %v360_v49  ;;  %v188_v57 = vmul.f32 %v829_v43, %v115_v51  ;;  %v639_v58 = vpack.c.bf16 %v361_v44, %v358_v47 }
  0xac   :  { %v189_v59 = vmul.f32 %v825_v41, %v115_v51  ;;  %v190_v60 = vmul.f32 %v827_v42, %v115_v51 }
  0xad   :  { %638 = vmatprep.subr.bf16.mxu0 %v637_v53  ;;  %667 = vmatpush3.bf16.msra.mxu1 %v666_v54  ;;  %v264_v61 = vpop.permute.xlu1 %263 }
  0xae   :  { %v259_v62 = vpop.permute.xlu0 %258  ;;  %v319_v63 = vadd.f32 %v264_v61, %v191_v52  ;;  %v320_v0 = vadd.f32 %v264_v61, %v192_v55  ;;  %v321_v1 = vadd.f32 %v264_v61, %v193_v56  ;;  %640 = vmatpush1.bf16.msra.mxu0 %v639_v58  ;;  %668 = vmatprep.subr.bf16.mxu1 %v685_v9 }
  0xaf   :  { %v316_v2 = vadd.f32 %v259_v62, %v188_v57  ;;  %v317_v3 = vadd.f32 %v259_v62, %v189_v59  ;;  %v318_v4 = vadd.f32 %v259_v62, %v190_v60 }
  0xb0   :  { %v367_v5 = vmax.f32 %v319_v63, 0.0  ;;  %v368_v6 = vmax.f32 %v320_v0, 0.0  ;;  %v369_v7 = vmax.f32 %v321_v1, 0.0 }
  0xb1   :  { %v364_v8 = vmax.f32 %v316_v2, 0.0  ;;  %v365_v10 = vmax.f32 %v317_v3, 0.0  ;;  %v366_v11 = vmax.f32 %v318_v4, 0.0  ;;  %v130_v12 = vpop.permute.xlu1 %129  ;;  %v53_v3 = vld [vmem:[%s909_s3] sm:$0x1] }
  0xb2   :  { %v125_v13 = vpop.permute.xlu0 %124  ;;  %v197_v14 = vmul.f32 %v829_v43, %v130_v12  ;;  %v198_v17 = vmul.f32 %v825_v41, %v130_v12  ;;  %v199_v18 = vmul.f32 %v827_v42, %v130_v12  ;;  %v688_v4 = vmov 1966171168  }
  0xb3   :  { %v641_v15 = vpack.c.bf16 %v368_v6, %v365_v10  ;;  %v669_v16 = vpack.c.bf16 %v369_v7, %v366_v11  ;;  %v194_v19 = vmul.f32 %v829_v43, %v125_v13  ;;  %v643_v20 = vpack.c.bf16 %v367_v5, %v364_v8 }
  0xb4   :  { %v195_v21 = vmul.f32 %v825_v41, %v125_v13  ;;  %v196_v22 = vmul.f32 %v827_v42, %v125_v13  ;;  %v534_v5 = vunpack.c.l.s4 %v688_v4  ;;  %v382_v10 = vstv %s910_s4 }
  0xb5   :  { %642 = vmatprep.subr.bf16.mxu0 %v641_v15  ;;  %670 = vmatpush3.bf16.msra.mxu1 %v669_v16  ;;  %v274_v23 = vpop.permute.xlu1 %273 }
  0xb6   :  { %v269_v24 = vpop.permute.xlu0 %268  ;;  %v325_v25 = vadd.f32 %v274_v23, %v197_v14  ;;  %v326_v26 = vadd.f32 %v274_v23, %v198_v17  ;;  %v327_v27 = vadd.f32 %v274_v23, %v199_v18  ;;  %644 = vmatpush1.bf16.msra.mxu0 %v643_v20  ;;  %671 = vmatprep.subr.bf16.mxu1 %v685_v9  ;;  %v535_v7 = vunpack.c.0.s8 %v534_v5 }
  0xb7   :  { %v322_v28 = vadd.f32 %v269_v24, %v194_v19  ;;  %v323_v29 = vadd.f32 %v269_v24, %v195_v21  ;;  %v324_v30 = vadd.f32 %v269_v24, %v196_v22  ;;  %v55_v19 = vld [vmem:[%s908_s0] ss:$4 sm:$0x7]  ;;  %v568_v24 = vld [vmem:[%s908_s0 + $0x3] ss:$4 sm:$0x7] }
  0xb8   :  { %v373_v31 = vmax.f32 %v325_v25, 0.0  ;;  %v374_v32 = vmax.f32 %v326_v26, 0.0  ;;  %v375_v33 = vmax.f32 %v327_v27, 0.0  ;;  %v538_v13 = vsub.s32 %v535_v7, %v817_v36 }
  0xb9   :  { %v370_v34 = vmax.f32 %v322_v28, 0.0  ;;  %v371_v37 = vmax.f32 %v323_v29, 0.0  ;;  %v372_v38 = vmax.f32 %v324_v30, 0.0  ;;  %v140_v39 = vpop.permute.xlu1 %139 }
  0xba   :  { %v135_v40 = vpop.permute.xlu0 %134  ;;  %v203_v44 = vmul.f32 %v829_v43, %v140_v39  ;;  %v204_v47 = vmul.f32 %v825_v41, %v140_v39  ;;  %v205_v48 = vmul.f32 %v827_v42, %v140_v39 }
  0xbb   :  { %v645_v45 = vpack.c.bf16 %v374_v32, %v371_v37  ;;  %v672_v46 = vpack.c.bf16 %v375_v33, %v372_v38  ;;  %v200_v49 = vmul.f32 %v829_v43, %v135_v40  ;;  %v647_v50 = vpack.c.bf16 %v373_v31, %v370_v34 }
  0xbc   :  { %v201_v51 = vmul.f32 %v825_v41, %v135_v40  ;;  %v202_v52 = vmul.f32 %v827_v42, %v135_v40 }
  0xbd   :  { %646 = vmatprep.subr.bf16.mxu0 %v645_v45  ;;  %673 = vmatpush3.bf16.msra.mxu1 %v672_v46  ;;  %v284_v53 = vpop.permute.xlu1 %283 }
  0xbe   :  { %v279_v54 = vpop.permute.xlu0 %278  ;;  %v331_v55 = vadd.f32 %v284_v53, %v203_v44  ;;  %v332_v56 = vadd.f32 %v284_v53, %v204_v47  ;;  %v333_v57 = vadd.f32 %v284_v53, %v205_v48  ;;  %648 = vmatpush1.bf16.msra.mxu0 %v647_v50  ;;  %674 = vmatprep.subr.bf16.mxu1 %v685_v9  ;;  %v566_v9 = vld [vmem:[%s908_s0 + $0x1] ss:$4 sm:$0x7] }
  0xbf   :  { %v328_v58 = vadd.f32 %v279_v54, %v200_v49  ;;  %v329_v59 = vadd.f32 %v279_v54, %v201_v51  ;;  %v330_v60 = vadd.f32 %v279_v54, %v202_v52  ;;  %v524_v6 = vmax.f32 %v566_v9, -7.0 }
  0xc0   :  { %v379_v61 = vmax.f32 %v331_v55, 0.0  ;;  %v380_v43 = vmax.f32 %v332_v56, 0.0  ;;  %v381_v62 = vmax.f32 %v333_v57, 0.0 }
  0xc1   :  { %v376_v63 = vmax.f32 %v328_v58, 0.0  ;;  %v377_v41 = vmax.f32 %v329_v59, 0.0  ;;  %v378_v0 = vmax.f32 %v330_v60, 0.0  ;;  %v525_v8 = vmin.f32 %v524_v6, 9.5 }
  0xc3   :  { %v651_v42 = vpack.c.bf16 %v379_v61, %v376_v63  ;;  %v649_v1 = vpack.c.bf16 %v380_v43, %v377_v41  ;;  %v675_v2 = vpack.c.bf16 %v381_v62, %v378_v0  ;;  %v526_v15 = vadd.f32 7.0, %v525_v8 }
  0xc5   :  { %650 = vmatprep.subr.bf16.mxu0 %v649_v1  ;;  %676 = vmatpush3.bf16.msra.mxu1 %v675_v2  ;;  %v527_v22 = vmul.f32 %v526_v15, %v55_v19 }
  0xc6   :  { %652 = vmatpush1.bf16.msra.mxu0 %v651_v42 }
  0xc7   :  { %v528_v26 = vmul.f32 %v568_v24, %v527_v22 }
  0xc8   :  { %619 = vmatmul.mubr.f32.vlgmr.msra.gmra.mrb[0].mxu1 %v53_v3 }
  0xc9   :  { %448 = vmatmul.mubr.f32.vlgmr.msra.gmra.mrb[0].mxu0 %v53_v3 }
 0x19b   :  { %v520_v11 = vpop.f32.mrb[0].mxu1 }
 0x19c   :  { %v449_v12 = vpop.f32.mrb[0].mxu0  ;;  %v521_v14 = vadd.f32 %v520_v11, %v382_v10  ;;  %v620_v16 = vpop.f32.mrb[1].mxu1 }
 0x19d   :  { %v450_v17 = vadd.f32 %v449_v12, %v382_v10  ;;  %v451_v18 = vpop.f32.mrb[1].mxu0 }
 0x19e   :  { %v452_v20 = vadd.f32 %v451_v18, %v382_v10  ;;  %v546_v23 = vrot.slane %v521_v14, %v538_v13 }
 0x1a0   :  { %v532_v21 = vcombine.low %v450_v17, %v452_v20 }
 0x1a2   :  { %v539_v25 = vrot.slane %v532_v21, %v538_v13 }
 0x1a4   :  { %v547_v36 = vcombine.low %v539_v25, %v546_v23 }
 0x1a6   :  { %v554_v27 = vrot.slane %v547_v36, %v538_v13 }
 0x1a8   :  { %v556_v28 = vmul.f32 %v554_v27, %v528_v26 }
 0x1aa   :  { %561 = vst.msk [vmem:[%s911_s5] sm:$0x7] %vm559_vm1, %v556_v28 }

</bundles_post_ra>
